<compile_context>
chip_gen: v7x
topology: tpu7x:2x2x1
jax: 0.10.0
libtpu: 0.0.40
codegen_flags: <defaults>
</compile_context>

<pallas_src>
import functools
import math

import jax
import jax.numpy as jnp
from jax.experimental import pallas as pl
from jax.experimental.pallas import tpu as pltpu


# ---------------------------------------------------------------------------
# Small helpers
# ---------------------------------------------------------------------------
def _divisor_tile(n, target):
    """Largest tile <= target that evenly divides n (keeps blocks unpadded)."""
    t = min(int(target), int(n))
    while n % t:
        t -= 1
    return t


def _rep(shape):
    """BlockSpec for a weight that is identical at every grid step (stays
    VMEM-resident; Pallas does not re-DMA an unchanged block index)."""
    nd = len(shape)
    return pl.BlockSpec(shape, lambda *_, _nd=nd: (0,) * _nd)


@functools.lru_cache(maxsize=None)
def _vmem_limit_bytes():
    # Generation-aware scoped-VMEM limit: ~75% of physical, capped at 100 MiB
    # (v7x: 64 MiB physical -> 48 MiB; v5e/v6e: 128 MiB -> 96/100 MiB).
    try:
        info = pltpu.get_tpu_info()
        cap = getattr(info, "vmem_capacity_bytes", None)
        if not cap:
            return None
        return int(min(100 * 1024 * 1024, (cap * 3) // 4))
    except Exception:
        return None


def _mosaic_params(dimension_semantics):
    kw = dict(dimension_semantics=dimension_semantics)
    lim = _vmem_limit_bytes()
    if lim is not None:
        kw["vmem_limit_bytes"] = lim
    return pltpu.CompilerParams(**kw)


# ---------------------------------------------------------------------------
# Kernel 1: fused QKV projection -> head-split [B, H, S, Dh] bf16
# ---------------------------------------------------------------------------
def _qkv_proj_kernel(H, Dh, x_ref, wqkv_ref, bqkv_ref, q_ref, k_ref, v_ref):
    E = H * Dh
    x = x_ref[0].astype(jnp.bfloat16)                               # [ts, E]
    qkv = jnp.dot(x, wqkv_ref[...],
                  preferred_element_type=jnp.float32) + bqkv_ref[...]  # [ts,3E] f32
    # 1/sqrt(Dh) is already folded into the Q columns host-side.
    for h in range(H):                                              # static slices
        q_ref[0, h, :, :] = qkv[:, 0 * E + h * Dh:0 * E + (h + 1) * Dh].astype(q_ref.dtype)
        k_ref[0, h, :, :] = qkv[:, 1 * E + h * Dh:1 * E + (h + 1) * Dh].astype(k_ref.dtype)
        v_ref[0, h, :, :] = qkv[:, 2 * E + h * Dh:2 * E + (h + 1) * Dh].astype(v_ref.dtype)


def qkv_proj(x, p, nhead, *, seq_tile=256, act_dtype=jnp.bfloat16):
    B, S, E = x.shape
    H = nhead
    Dh = E // H
    ts = _divisor_tile(S, seq_tile)
    kernel = functools.partial(_qkv_proj_kernel, H, Dh)
    return pl.pallas_call(
        kernel,
        out_shape=tuple(jax.ShapeDtypeStruct((B, H, S, Dh), act_dtype) for _ in range(3)),
        grid=(B, S // ts),
        in_specs=[
            pl.BlockSpec((1, ts, E), lambda b, si: (b, si, 0)),
            _rep((E, 3 * E)),
            _rep((1, 3 * E)),
        ],
        out_specs=tuple(
            pl.BlockSpec((1, H, ts, Dh), lambda b, si: (b, 0, si, 0)) for _ in range(3)),
        compiler_params=_mosaic_params(("parallel", "parallel")),
    )(x, p["wqkv"], p["bqkv"])


# ---------------------------------------------------------------------------
# Kernel 2a: attention with head-averaged weights (exact softmax, q-tiled)
# ---------------------------------------------------------------------------
def _attn_exact_kernel(H, Dh, q_ref, k_ref, v_ref, ctx_ref, attn_ref):
    q = q_ref[0]                                                    # [H, tq, Dh] bf16
    k = k_ref[0]                                                    # [H, S,  Dh] bf16
    v = v_ref[0]
    s = jnp.einsum('hqd,hkd->hqk', q, k,
                   preferred_element_type=jnp.float32)              # [H, tq, S] f32
    s = s - jnp.max(s, axis=-1, keepdims=True)
    p = jnp.exp(s)
    # Exact divide on the weights path (parity with PyTorch softmax).
    p = p / jnp.sum(p, axis=-1, keepdims=True)
    attn_ref[0, :, :] = jnp.mean(p, axis=0)                         # head-averaged
    ctx = jnp.einsum('hqk,hkd->hqd', p.astype(v.dtype), v,
                     preferred_element_type=jnp.float32)            # [H, tq, Dh] f32
    for h in range(H):
        ctx_ref[0, :, h * Dh:(h + 1) * Dh] = ctx[h].astype(ctx_ref.dtype)


def attention_with_weights(q, k, v, *, q_tile=256, act_dtype=jnp.bfloat16):
    B, H, S, Dh = q.shape
    E = H * Dh
    tq = _divisor_tile(S, q_tile)
    kernel = functools.partial(_attn_exact_kernel, H, Dh)
    return pl.pallas_call(
        kernel,
        out_shape=(jax.ShapeDtypeStruct((B, S, E), act_dtype),
                   jax.ShapeDtypeStruct((B, S, S), jnp.float32)),
        grid=(B, S // tq),
        in_specs=[
            pl.BlockSpec((1, H, tq, Dh), lambda b, qi: (b, 0, qi, 0)),
            pl.BlockSpec((1, H, S, Dh), lambda b, qi: (b, 0, 0, 0)),
            pl.BlockSpec((1, H, S, Dh), lambda b, qi: (b, 0, 0, 0)),
        ],
        out_specs=(pl.BlockSpec((1, tq, E), lambda b, qi: (b, qi, 0)),
                   pl.BlockSpec((1, tq, S), lambda b, qi: (b, qi, 0))),
        compiler_params=_mosaic_params(("parallel", "parallel")),
    )(q, k, v)


# ---------------------------------------------------------------------------
# Kernel 2b: flash attention (online softmax, kv-tiled) -- need_weights=False
# ---------------------------------------------------------------------------
def _attn_flash_kernel(H, Dh, q_ref, k_ref, v_ref, ctx_ref, m_sc, l_sc, acc_sc):
    ki = pl.program_id(2)

    @pl.when(ki == 0)
    def _():
        m_sc[...] = jnp.full_like(m_sc, -jnp.inf)
        l_sc[...] = jnp.zeros_like(l_sc)
        acc_sc[...] = jnp.zeros_like(acc_sc)

    q = q_ref[0]                                                    # [H, tq,  Dh] bf16
    k = k_ref[0]                                                    # [H, tkv, Dh] bf16
    v = v_ref[0]
    s = jnp.einsum('hqd,hkd->hqk', q, k,
                   preferred_element_type=jnp.float32)              # [H, tq, tkv]
    m_new = jnp.maximum(m_sc[...], jnp.max(s, axis=-1, keepdims=True))
    alpha = jnp.exp(m_sc[...] - m_new)
    p = jnp.exp(s - m_new)
    l_sc[...] = alpha * l_sc[...] + jnp.sum(p, axis=-1, keepdims=True)
    acc_sc[...] = alpha * acc_sc[...] + jnp.einsum(
        'hqk,hkd->hqd', p.astype(v.dtype), v, preferred_element_type=jnp.float32)
    m_sc[...] = m_new

    @pl.when(ki == pl.num_programs(2) - 1)
    def _():
        out = acc_sc[...] * pl.reciprocal(l_sc[...], approx=True)   # EUP, not VALU divide
        for h in range(H):
            ctx_ref[0, :, h * Dh:(h + 1) * Dh] = out[h].astype(ctx_ref.dtype)


def attention_flash(q, k, v, *, q_tile=256, kv_tile=512, act_dtype=jnp.bfloat16):
    B, H, S, Dh = q.shape
    E = H * Dh
    tq = _divisor_tile(S, q_tile)
    tkv = _divisor_tile(S, kv_tile)
    kernel = functools.partial(_attn_flash_kernel, H, Dh)
    return pl.pallas_call(
        kernel,
        out_shape=jax.ShapeDtypeStruct((B, S, E), act_dtype),
        grid=(B, S // tq, S // tkv),
        in_specs=[
            pl.BlockSpec((1, H, tq, Dh), lambda b, qi, ki: (b, 0, qi, 0)),
            pl.BlockSpec((1, H, tkv, Dh), lambda b, qi, ki: (b, 0, ki, 0)),
            pl.BlockSpec((1, H, tkv, Dh), lambda b, qi, ki: (b, 0, ki, 0)),
        ],
        out_specs=pl.BlockSpec((1, tq, E), lambda b, qi, ki: (b, qi, 0)),
        scratch_shapes=[pltpu.VMEM((H, tq, 1), jnp.float32),
                        pltpu.VMEM((H, tq, 1), jnp.float32),
                        pltpu.VMEM((H, tq, Dh), jnp.float32)],
        compiler_params=_mosaic_params(("parallel", "parallel", "arbitrary")),
    )(q, k, v)


# ---------------------------------------------------------------------------
# Kernel 3: attention out-projection + residual + LayerNorm1 (row-tiled)
# ---------------------------------------------------------------------------
def _attn_out_norm_kernel(eps, ctx_ref, x_ref, wo_ref, bo_ref, g_ref, beta_ref, o_ref):
    attn_out = jnp.dot(ctx_ref[...].astype(jnp.bfloat16), wo_ref[...],
                       preferred_element_type=jnp.float32) + bo_ref[...]
    src = x_ref[...].astype(jnp.float32) + attn_out                 # dropout1 = identity
    mu = jnp.mean(src, axis=-1, keepdims=True)
    var = jnp.mean(jnp.square(src - mu), axis=-1, keepdims=True)
    y = (src - mu) * jax.lax.rsqrt(var + eps) * g_ref[...] + beta_ref[...]
    o_ref[...] = y.astype(o_ref.dtype)


def attn_out_layernorm(ctx2d, x2d, p, *, eps=1e-5, row_tile=256, act_dtype=jnp.bfloat16):
    M, E = ctx2d.shape
    tm = _divisor_tile(M, row_tile)
    kernel = functools.partial(_attn_out_norm_kernel, eps)
    return pl.pallas_call(
        kernel,
        out_shape=jax.ShapeDtypeStruct((M, E), act_dtype),
        grid=(M // tm,),
        in_specs=[
            pl.BlockSpec((tm, E), lambda i: (i, 0)),
            pl.BlockSpec((tm, E), lambda i: (i, 0)),
            _rep((E, E)), _rep((1, E)), _rep((1, E)), _rep((1, E)),
        ],
        out_specs=pl.BlockSpec((tm, E), lambda i: (i, 0)),
        compiler_params=_mosaic_params(("parallel",)),
    )(ctx2d, x2d, p["wo"], p["bo"], p["g1"], p["beta1"])


# ---------------------------------------------------------------------------
# Kernel 4: FFN (F-dimension streamed) + residual + LayerNorm2
# ---------------------------------------------------------------------------
def _ffn_norm_kernel(eps, approx_gelu,
                     src_ref, w1_ref, b1_ref, w2_ref, b2_ref, g_ref, beta_ref,
                     o_ref, acc_ref):
    f = pl.program_id(1)

    @pl.when(f == 0)
    def _():
        acc_ref[...] = jnp.zeros_like(acc_ref)

    h = jnp.dot(src_ref[...].astype(jnp.bfloat16), w1_ref[...],
                preferred_element_type=jnp.float32) + b1_ref[...]
    h = jax.nn.gelu(h, approximate=approx_gelu)                     # exact erf by default
    acc_ref[...] += jnp.dot(h.astype(jnp.bfloat16), w2_ref[...],
                            preferred_element_type=jnp.float32)

    @pl.when(f == pl.num_programs(1) - 1)
    def _():
        out = src_ref[...].astype(jnp.float32) + acc_ref[...] + b2_ref[...]
        mu = jnp.mean(out, axis=-1, keepdims=True)
        var = jnp.mean(jnp.square(out - mu), axis=-1, keepdims=True)
        y = (out - mu) * jax.lax.rsqrt(var + eps) * g_ref[...] + beta_ref[...]
        o_ref[...] = y.astype(o_ref.dtype)


def ffn_layernorm(src2d, p, *, eps=1e-5, approx_gelu=False, row_tile=256,
                  f_tile=1024, act_dtype=jnp.bfloat16):
    M, E = src2d.shape
    F_dim = p["w1"].shape[1]
    tm = _divisor_tile(M, row_tile)
    tf = _divisor_tile(F_dim, f_tile)
    kernel = functools.partial(_ffn_norm_kernel, eps, approx_gelu)
    return pl.pallas_call(
        kernel,
        out_shape=jax.ShapeDtypeStruct((M, E), act_dtype),
        grid=(M // tm, F_dim // tf),                                # F innermost, streamed
        in_specs=[
            pl.BlockSpec((tm, E), lambda i, f: (i, 0)),             # resident across F
            pl.BlockSpec((E, tf), lambda i, f: (0, f)),
            pl.BlockSpec((1, tf), lambda i, f: (0, f)),
            pl.BlockSpec((tf, E), lambda i, f: (f, 0)),
            _rep((1, E)), _rep((1, E)), _rep((1, E)),
        ],
        out_specs=pl.BlockSpec((tm, E), lambda i, f: (i, 0)),
        scratch_shapes=[pltpu.VMEM((tm, E), jnp.float32)],
        compiler_params=_mosaic_params(("parallel", "arbitrary")),
    )(src2d, p["w1"], p["b1"], p["w2"], p["b2"], p["g2"], p["beta2"])


# ---------------------------------------------------------------------------
# Kernel 5: lm_head, tiled over (rows, vocab)
# ---------------------------------------------------------------------------
def _lm_head_kernel(x_ref, w_ref, b_ref, o_ref):
    o_ref[...] = (jnp.dot(x_ref[...], w_ref[...],
                          preferred_element_type=jnp.float32) + b_ref[...]
                  ).astype(o_ref.dtype)


def lm_head(x2d, w, b, *, tile_m=512, tile_v=1024, out_dtype=jnp.float32):
    """x2d: [M, E] bf16, w: [E, V] bf16, b: [1, V] f32 -> [M, V] out_dtype."""
    M, E = x2d.shape
    V = w.shape[1]
    tm = _divisor_tile(M, tile_m)
    tv = _divisor_tile(V, tile_v)
    # vocab axis innermost => activation block index constant across steps
    # (stays resident; only weight/bias/output tiles stream from/to HBM).
    return pl.pallas_call(
        _lm_head_kernel,
        out_shape=jax.ShapeDtypeStruct((M, V), out_dtype),
        grid=(M // tm, V // tv),
        in_specs=[pl.BlockSpec((tm, E), lambda i, j: (i, 0)),
                  pl.BlockSpec((E, tv), lambda i, j: (0, j)),
                  pl.BlockSpec((1, tv), lambda i, j: (0, j))],
        out_specs=pl.BlockSpec((tm, tv), lambda i, j: (i, j)),
        compiler_params=_mosaic_params(("parallel", "parallel")),
    )(x2d, w, b)


# ---------------------------------------------------------------------------
# One encoder layer (post-norm) assembled from the kernels above
# ---------------------------------------------------------------------------
def transformer_layer(x, p, nhead, *, eps=1e-5, need_weights=True, approx_gelu=False,
                      act_dtype=jnp.bfloat16, seq_tile=256, q_tile=256, kv_tile=512,
                      row_tile=256, f_tile=1024):
    """x: [B, S, E] act_dtype. Returns (y [B,S,E] act_dtype, head-avg attn [B,S,S] f32 or None)."""
    B, S, E = x.shape
    q, k, v = qkv_proj(x, p, nhead, seq_tile=seq_tile, act_dtype=act_dtype)
    if need_weights:
        ctx, attn = attention_with_weights(q, k, v, q_tile=q_tile, act_dtype=act_dtype)
    else:
        ctx = attention_flash(q, k, v, q_tile=q_tile, kv_tile=kv_tile, act_dtype=act_dtype)
        attn = None
    x2 = x.reshape(B * S, E)
    ctx2 = ctx.reshape(B * S, E)
    src = attn_out_layernorm(ctx2, x2, p, eps=eps, row_tile=row_tile, act_dtype=act_dtype)
    y = ffn_layernorm(src, p, eps=eps, approx_gelu=approx_gelu, row_tile=row_tile,
                      f_tile=f_tile, act_dtype=act_dtype)
    return y.reshape(B, S, E), attn


# ---------------------------------------------------------------------------
# Parameter construction / host-side preparation
# ---------------------------------------------------------------------------
def init_params(key, vocab, hidden, n_layers, ffn, nhead):
    scale = 0.02
    keys = iter(jax.random.split(key, 2 + 4 * n_layers))

    def nrm(shape):
        return scale * jax.random.normal(next(keys), shape, jnp.float32)

    params = {
        "embed": nrm((vocab, hidden)),
        "lm_w": nrm((hidden, vocab)),
        "lm_b": jnp.zeros((1, vocab), jnp.float32),
        "layers": [],
    }
    for _ in range(n_layers):
        params["layers"].append({
            "wqkv": nrm((hidden, 3 * hidden)),
            "bqkv": jnp.zeros((1, 3 * hidden), jnp.float32),
            "wo": nrm((hidden, hidden)),
            "bo": jnp.zeros((1, hidden), jnp.float32),
            "g1": jnp.ones((1, hidden), jnp.float32),
            "beta1": jnp.zeros((1, hidden), jnp.float32),
            "g2": jnp.ones((1, hidden), jnp.float32),
            "beta2": jnp.zeros((1, hidden), jnp.float32),
            "w1": nrm((hidden, ffn)),
            "b1": jnp.zeros((1, ffn), jnp.float32),
            "w2": nrm((ffn, hidden)),
            "b2": jnp.zeros((1, hidden), jnp.float32),
        })
    return params


def prepare_params(params, nhead):
    """One-time host-side transform: fold the 1/sqrt(Dh) attention scale into the
    Q columns of the fused QKV projection; cast matmul weights to bf16 (biases,
    LayerNorm params and the embedding stay f32)."""
    E = params["embed"].shape[1]
    scale = 1.0 / math.sqrt(E // nhead)
    out = {
        "embed": params["embed"],
        "lm_w": params["lm_w"].astype(jnp.bfloat16),
        "lm_b": params["lm_b"],
        "layers": [],
    }
    for lp in params["layers"]:
        out["layers"].append({
            "wqkv": lp["wqkv"].at[:, :E].multiply(scale).astype(jnp.bfloat16),
            "bqkv": lp["bqkv"].at[:, :E].multiply(scale),
            "wo": lp["wo"].astype(jnp.bfloat16), "bo": lp["bo"],
            "g1": lp["g1"], "beta1": lp["beta1"],
            "g2": lp["g2"], "beta2": lp["beta2"],
            "w1": lp["w1"].astype(jnp.bfloat16), "b1": lp["b1"],
            "w2": lp["w2"].astype(jnp.bfloat16), "b2": lp["b2"],
        })
    return out


# ---------------------------------------------------------------------------
# Model glue (embedding gather + layer loop) in plain JAX
# ---------------------------------------------------------------------------
def gemma3_forward(input_ids, params, nhead, *, need_weights=True,
                   act_dtype=jnp.bfloat16, logits_dtype=jnp.float32,
                   lm_tile_m=512, lm_tile_v=1024):
    x = params["embed"][input_ids].astype(act_dtype)         # [B, S, E] gather (glue)
    all_hidden, all_attn = [], []
    for lp in params["layers"]:
        x, attn = transformer_layer(x, lp, nhead, need_weights=need_weights,
                                    act_dtype=act_dtype)
        all_hidden.append(x.astype(jnp.float32))              # [B, S, E]
        if need_weights:
            all_attn.append(attn[:, None, :, :])               # [B, 1, S, S]
    B, S, E = x.shape
    logits = lm_head(x.reshape(B * S, E).astype(jnp.bfloat16),
                     params["lm_w"], params["lm_b"],
                     tile_m=lm_tile_m, tile_v=lm_tile_v, out_dtype=logits_dtype)
    return logits.reshape(B, S, -1), all_hidden, all_attn


if __name__ == "__main__":
    # Small shapes consistent with the module's forward:
    #   input_ids: [batch, seq] int32; hidden=32, heads=4, ffn=64, 2 layers.
    B, S = 2, 8
    hidden, nhead, ffn, n_layers, vocab = 32, 4, 64, 2, 512

    key = jax.random.PRNGKey(0)
    k_ids, k_params = jax.random.split(key)
    input_ids = jax.random.randint(k_ids, (B, S), 0, vocab, dtype=jnp.int32)

    params = prepare_params(
        init_params(k_params, vocab, hidden, n_layers, ffn, nhead), nhead)

    # Full forward with attention weights (matches the PyTorch module's outputs).
    logits, hidden_states, attentions = gemma3_forward(input_ids, params, nhead,
                                                       need_weights=True)
    jax.block_until_ready(logits)
    for h in hidden_states:
        jax.block_until_ready(h)
    for a in attentions:
        jax.block_until_ready(a)

    assert logits.shape == (B, S, vocab) and logits.dtype == jnp.float32
    assert len(hidden_states) == n_layers and len(attentions) == n_layers
    assert all(h.shape == (B, S, hidden) for h in hidden_states)
    assert all(a.shape == (B, 1, S, S) for a in attentions)
    assert bool(jnp.isfinite(logits).all())
    # exact-softmax weights: head-averaged rows sum to ~1
    assert bool(jnp.allclose(attentions[0].sum(-1), 1.0, atol=1e-3))

    # Exercise the flash (kv-tiled online-softmax, need_weights=False) path on
    # layer 0 and check it matches the exact-softmax path.
    x0 = params["embed"][input_ids].astype(jnp.bfloat16)
    y_flash, attn_none = transformer_layer(x0, params["layers"][0], nhead,
                                           need_weights=False)
    jax.block_until_ready(y_flash)
    assert attn_none is None
    assert y_flash.shape == (B, S, hidden)
    assert bool(jnp.allclose(y_flash.astype(jnp.float32), hidden_states[0], atol=1e-1))

    print("KERNEL_OK")
</pallas_src>

<mosaic_0001>
module attributes {stable_mosaic.version = 11 : i64} {
  func.func @_qkv_proj_kernel(%arg0: i32, %arg1: i32, %arg2: memref<1x8x32xbf16, #tpu.memory_space<vmem>>, %arg3: memref<32x96xbf16, #tpu.memory_space<vmem>>, %arg4: memref<1x96xf32, #tpu.memory_space<vmem>>, %arg5: memref<1x4x8x8xbf16, #tpu.memory_space<vmem>>, %arg6: memref<1x4x8x8xbf16, #tpu.memory_space<vmem>>, %arg7: memref<1x4x8x8xbf16, #tpu.memory_space<vmem>>) attributes {dimension_semantics = [#tpu.dimension_semantics<parallel>, #tpu.dimension_semantics<parallel>], iteration_bounds = array<i64: 2, 1>, scalar_prefetch = 0 : i64, scratch_operands = 0 : i64, tpu.core_type = #tpu.core_type<tc>, window_params = [{transform_indices = @transform_0, window_bounds = array<i64: 1, 8, 32>}, {pipeline_mode = #tpu.pipeline_mode<synchronous>, transform_indices = @transform_1, window_bounds = array<i64: 32, 96>}, {pipeline_mode = #tpu.pipeline_mode<synchronous>, transform_indices = @transform_2, window_bounds = array<i64: 1, 96>}, {transform_indices = @transform_3, window_bounds = array<i64: 1, 4, 8, 8>}, {transform_indices = @transform_4, window_bounds = array<i64: 1, 4, 8, 8>}, {transform_indices = @transform_5, window_bounds = array<i64: 1, 4, 8, 8>}]} {
    %c0 = arith.constant 0 : index
    %c0_0 = arith.constant 0 : index
    %c0_1 = arith.constant 0 : index
    %0 = vector.load %arg2[%c0, %c0_0, %c0_1] : memref<1x8x32xbf16, #tpu.memory_space<vmem>>, vector<1x8x32xbf16>
    %1 = vector.shape_cast %0 : vector<1x8x32xbf16> to vector<8x32xbf16>
    %c0_2 = arith.constant 0 : index
    %c0_3 = arith.constant 0 : index
    %2 = vector.load %arg3[%c0_2, %c0_3] : memref<32x96xbf16, #tpu.memory_space<vmem>>, vector<32x96xbf16>
    %cst = arith.constant dense<0.000000e+00> : vector<8x96xf32>
    %3 = tpu.matmul %1, %2, %cst {dimension_numbers = #tpu.dot_dimension_numbers<[1], [0], [0], [1], [0, 0, 1, 1], [], []>} : vector<8x32xbf16>, vector<32x96xbf16>, vector<8x96xf32> -> vector<8x96xf32>
    %c0_4 = arith.constant 0 : index
    %c0_5 = arith.constant 0 : index
    %4 = vector.load %arg4[%c0_4, %c0_5] : memref<1x96xf32, #tpu.memory_space<vmem>>, vector<1x96xf32>
    %5 = vector.broadcast %4 : vector<1x96xf32> to vector<8x96xf32>
    %6 = arith.addf %3, %5 : vector<8x96xf32>
    %7 = vector.extract_strided_slice %6 {offsets = [0, 0], sizes = [8, 8], strides = [1, 1]} : vector<8x96xf32> to vector<8x8xf32>
    %8 = arith.truncf %7 : vector<8x8xf32> to vector<8x8xbf16>
    %c0_6 = arith.constant 0 : index
    %c0_7 = arith.constant 0 : index
    %c0_8 = arith.constant 0 : index
    %c0_9 = arith.constant 0 : index
    %9 = vector.load %arg5[%c0_6, %c0_7, %c0_8, %c0_9] : memref<1x4x8x8xbf16, #tpu.memory_space<vmem>>, vector<1x1x8x8xbf16>
    %10 = vector.shape_cast %9 : vector<1x1x8x8xbf16> to vector<8x8xbf16>
    %11 = vector.shape_cast %8 : vector<8x8xbf16> to vector<1x1x8x8xbf16>
    tpu.vector_store %arg5[%c0_6, %c0_7, %c0_8, %c0_9], %11 {strides = array<i32>} : memref<1x4x8x8xbf16, #tpu.memory_space<vmem>>, vector<1x1x8x8xbf16>,
    %12 = vector.extract_strided_slice %6 {offsets = [0, 32], sizes = [8, 8], strides = [1, 1]} : vector<8x96xf32> to vector<8x8xf32>
    %13 = arith.truncf %12 : vector<8x8xf32> to vector<8x8xbf16>
    %c0_10 = arith.constant 0 : index
    %c0_11 = arith.constant 0 : index
    %c0_12 = arith.constant 0 : index
    %c0_13 = arith.constant 0 : index
    %14 = vector.load %arg6[%c0_10, %c0_11, %c0_12, %c0_13] : memref<1x4x8x8xbf16, #tpu.memory_space<vmem>>, vector<1x1x8x8xbf16>
    %15 = vector.shape_cast %14 : vector<1x1x8x8xbf16> to vector<8x8xbf16>
    %16 = vector.shape_cast %13 : vector<8x8xbf16> to vector<1x1x8x8xbf16>
    tpu.vector_store %arg6[%c0_10, %c0_11, %c0_12, %c0_13], %16 {strides = array<i32>} : memref<1x4x8x8xbf16, #tpu.memory_space<vmem>>, vector<1x1x8x8xbf16>,
    %17 = vector.extract_strided_slice %6 {offsets = [0, 64], sizes = [8, 8], strides = [1, 1]} : vector<8x96xf32> to vector<8x8xf32>
    %18 = arith.truncf %17 : vector<8x8xf32> to vector<8x8xbf16>
    %c0_14 = arith.constant 0 : index
    %c0_15 = arith.constant 0 : index
    %c0_16 = arith.constant 0 : index
    %c0_17 = arith.constant 0 : index
    %19 = vector.load %arg7[%c0_14, %c0_15, %c0_16, %c0_17] : memref<1x4x8x8xbf16, #tpu.memory_space<vmem>>, vector<1x1x8x8xbf16>
    %20 = vector.shape_cast %19 : vector<1x1x8x8xbf16> to vector<8x8xbf16>
    %21 = vector.shape_cast %18 : vector<8x8xbf16> to vector<1x1x8x8xbf16>
    tpu.vector_store %arg7[%c0_14, %c0_15, %c0_16, %c0_17], %21 {strides = array<i32>} : memref<1x4x8x8xbf16, #tpu.memory_space<vmem>>, vector<1x1x8x8xbf16>,
    %22 = vector.extract_strided_slice %6 {offsets = [0, 8], sizes = [8, 8], strides = [1, 1]} : vector<8x96xf32> to vector<8x8xf32>
    %23 = arith.truncf %22 : vector<8x8xf32> to vector<8x8xbf16>
    %c0_18 = arith.constant 0 : index
    %c1 = arith.constant 1 : index
    %c0_19 = arith.constant 0 : index
    %c0_20 = arith.constant 0 : index
    %24 = vector.load %arg5[%c0_18, %c1, %c0_19, %c0_20] : memref<1x4x8x8xbf16, #tpu.memory_space<vmem>>, vector<1x1x8x8xbf16>
    %25 = vector.shape_cast %24 : vector<1x1x8x8xbf16> to vector<8x8xbf16>
    %26 = vector.shape_cast %23 : vector<8x8xbf16> to vector<1x1x8x8xbf16>
    tpu.vector_store %arg5[%c0_18, %c1, %c0_19, %c0_20], %26 {strides = array<i32>} : memref<1x4x8x8xbf16, #tpu.memory_space<vmem>>, vector<1x1x8x8xbf16>,
    %27 = vector.extract_strided_slice %6 {offsets = [0, 40], sizes = [8, 8], strides = [1, 1]} : vector<8x96xf32> to vector<8x8xf32>
    %28 = arith.truncf %27 : vector<8x8xf32> to vector<8x8xbf16>
    %c0_21 = arith.constant 0 : index
    %c1_22 = arith.constant 1 : index
    %c0_23 = arith.constant 0 : index
    %c0_24 = arith.constant 0 : index
    %29 = vector.load %arg6[%c0_21, %c1_22, %c0_23, %c0_24] : memref<1x4x8x8xbf16, #tpu.memory_space<vmem>>, vector<1x1x8x8xbf16>
    %30 = vector.shape_cast %29 : vector<1x1x8x8xbf16> to vector<8x8xbf16>
    %31 = vector.shape_cast %28 : vector<8x8xbf16> to vector<1x1x8x8xbf16>
    tpu.vector_store %arg6[%c0_21, %c1_22, %c0_23, %c0_24], %31 {strides = array<i32>} : memref<1x4x8x8xbf16, #tpu.memory_space<vmem>>, vector<1x1x8x8xbf16>,
    %32 = vector.extract_strided_slice %6 {offsets = [0, 72], sizes = [8, 8], strides = [1, 1]} : vector<8x96xf32> to vector<8x8xf32>
    %33 = arith.truncf %32 : vector<8x8xf32> to vector<8x8xbf16>
    %c0_25 = arith.constant 0 : index
    %c1_26 = arith.constant 1 : index
    %c0_27 = arith.constant 0 : index
    %c0_28 = arith.constant 0 : index
    %34 = vector.load %arg7[%c0_25, %c1_26, %c0_27, %c0_28] : memref<1x4x8x8xbf16, #tpu.memory_space<vmem>>, vector<1x1x8x8xbf16>
    %35 = vector.shape_cast %34 : vector<1x1x8x8xbf16> to vector<8x8xbf16>
    %36 = vector.shape_cast %33 : vector<8x8xbf16> to vector<1x1x8x8xbf16>
    tpu.vector_store %arg7[%c0_25, %c1_26, %c0_27, %c0_28], %36 {strides = array<i32>} : memref<1x4x8x8xbf16, #tpu.memory_space<vmem>>, vector<1x1x8x8xbf16>,
    %37 = vector.extract_strided_slice %6 {offsets = [0, 16], sizes = [8, 8], strides = [1, 1]} : vector<8x96xf32> to vector<8x8xf32>
    %38 = arith.truncf %37 : vector<8x8xf32> to vector<8x8xbf16>
    %c0_29 = arith.constant 0 : index
    %c2 = arith.constant 2 : index
    %c0_30 = arith.constant 0 : index
    %c0_31 = arith.constant 0 : index
    %39 = vector.load %arg5[%c0_29, %c2, %c0_30, %c0_31] : memref<1x4x8x8xbf16, #tpu.memory_space<vmem>>, vector<1x1x8x8xbf16>
    %40 = vector.shape_cast %39 : vector<1x1x8x8xbf16> to vector<8x8xbf16>
    %41 = vector.shape_cast %38 : vector<8x8xbf16> to vector<1x1x8x8xbf16>
    tpu.vector_store %arg5[%c0_29, %c2, %c0_30, %c0_31], %41 {strides = array<i32>} : memref<1x4x8x8xbf16, #tpu.memory_space<vmem>>, vector<1x1x8x8xbf16>,
    %42 = vector.extract_strided_slice %6 {offsets = [0, 48], sizes = [8, 8], strides = [1, 1]} : vector<8x96xf32> to vector<8x8xf32>
    %43 = arith.truncf %42 : vector<8x8xf32> to vector<8x8xbf16>
    %c0_32 = arith.constant 0 : index
    %c2_33 = arith.constant 2 : index
    %c0_34 = arith.constant 0 : index
    %c0_35 = arith.constant 0 : index
    %44 = vector.load %arg6[%c0_32, %c2_33, %c0_34, %c0_35] : memref<1x4x8x8xbf16, #tpu.memory_space<vmem>>, vector<1x1x8x8xbf16>
    %45 = vector.shape_cast %44 : vector<1x1x8x8xbf16> to vector<8x8xbf16>
    %46 = vector.shape_cast %43 : vector<8x8xbf16> to vector<1x1x8x8xbf16>
    tpu.vector_store %arg6[%c0_32, %c2_33, %c0_34, %c0_35], %46 {strides = array<i32>} : memref<1x4x8x8xbf16, #tpu.memory_space<vmem>>, vector<1x1x8x8xbf16>,
    %47 = vector.extract_strided_slice %6 {offsets = [0, 80], sizes = [8, 8], strides = [1, 1]} : vector<8x96xf32> to vector<8x8xf32>
    %48 = arith.truncf %47 : vector<8x8xf32> to vector<8x8xbf16>
    %c0_36 = arith.constant 0 : index
    %c2_37 = arith.constant 2 : index
    %c0_38 = arith.constant 0 : index
    %c0_39 = arith.constant 0 : index
    %49 = vector.load %arg7[%c0_36, %c2_37, %c0_38, %c0_39] : memref<1x4x8x8xbf16, #tpu.memory_space<vmem>>, vector<1x1x8x8xbf16>
    %50 = vector.shape_cast %49 : vector<1x1x8x8xbf16> to vector<8x8xbf16>
    %51 = vector.shape_cast %48 : vector<8x8xbf16> to vector<1x1x8x8xbf16>
    tpu.vector_store %arg7[%c0_36, %c2_37, %c0_38, %c0_39], %51 {strides = array<i32>} : memref<1x4x8x8xbf16, #tpu.memory_space<vmem>>, vector<1x1x8x8xbf16>,
    %52 = vector.extract_strided_slice %6 {offsets = [0, 24], sizes = [8, 8], strides = [1, 1]} : vector<8x96xf32> to vector<8x8xf32>
    %53 = arith.truncf %52 : vector<8x8xf32> to vector<8x8xbf16>
    %c0_40 = arith.constant 0 : index
    %c3 = arith.constant 3 : index
    %c0_41 = arith.constant 0 : index
    %c0_42 = arith.constant 0 : index
    %54 = vector.load %arg5[%c0_40, %c3, %c0_41, %c0_42] : memref<1x4x8x8xbf16, #tpu.memory_space<vmem>>, vector<1x1x8x8xbf16>
    %55 = vector.shape_cast %54 : vector<1x1x8x8xbf16> to vector<8x8xbf16>
    %56 = vector.shape_cast %53 : vector<8x8xbf16> to vector<1x1x8x8xbf16>
    tpu.vector_store %arg5[%c0_40, %c3, %c0_41, %c0_42], %56 {strides = array<i32>} : memref<1x4x8x8xbf16, #tpu.memory_space<vmem>>, vector<1x1x8x8xbf16>,
    %57 = vector.extract_strided_slice %6 {offsets = [0, 56], sizes = [8, 8], strides = [1, 1]} : vector<8x96xf32> to vector<8x8xf32>
    %58 = arith.truncf %57 : vector<8x8xf32> to vector<8x8xbf16>
    %c0_43 = arith.constant 0 : index
    %c3_44 = arith.constant 3 : index
    %c0_45 = arith.constant 0 : index
    %c0_46 = arith.constant 0 : index
    %59 = vector.load %arg6[%c0_43, %c3_44, %c0_45, %c0_46] : memref<1x4x8x8xbf16, #tpu.memory_space<vmem>>, vector<1x1x8x8xbf16>
    %60 = vector.shape_cast %59 : vector<1x1x8x8xbf16> to vector<8x8xbf16>
    %61 = vector.shape_cast %58 : vector<8x8xbf16> to vector<1x1x8x8xbf16>
    tpu.vector_store %arg6[%c0_43, %c3_44, %c0_45, %c0_46], %61 {strides = array<i32>} : memref<1x4x8x8xbf16, #tpu.memory_space<vmem>>, vector<1x1x8x8xbf16>,
    %62 = vector.extract_strided_slice %6 {offsets = [0, 88], sizes = [8, 8], strides = [1, 1]} : vector<8x96xf32> to vector<8x8xf32>
    %63 = arith.truncf %62 : vector<8x8xf32> to vector<8x8xbf16>
    %c0_47 = arith.constant 0 : index
    %c3_48 = arith.constant 3 : index
    %c0_49 = arith.constant 0 : index
    %c0_50 = arith.constant 0 : index
    %64 = vector.load %arg7[%c0_47, %c3_48, %c0_49, %c0_50] : memref<1x4x8x8xbf16, #tpu.memory_space<vmem>>, vector<1x1x8x8xbf16>
    %65 = vector.shape_cast %64 : vector<1x1x8x8xbf16> to vector<8x8xbf16>
    %66 = vector.shape_cast %63 : vector<8x8xbf16> to vector<1x1x8x8xbf16>
    tpu.vector_store %arg7[%c0_47, %c3_48, %c0_49, %c0_50], %66 {strides = array<i32>} : memref<1x4x8x8xbf16, #tpu.memory_space<vmem>>, vector<1x1x8x8xbf16>,
    return
  }
  func.func @transform_0(%arg0: i32, %arg1: i32) -> (i32, i32, i32) {
    %c0_i32 = arith.constant 0 : i32
    %c0_i32_0 = arith.constant 0 : i32
    return %arg0, %arg1, %c0_i32 : i32, i32, i32
  }
  func.func @transform_1(%arg0: i32, %arg1: i32) -> (i32, i32) {
    %c0_i32 = arith.constant 0 : i32
    %c0_i32_0 = arith.constant 0 : i32
    %c0_i32_1 = arith.constant 0 : i32
    return %c0_i32, %c0_i32_0 : i32, i32
  }
  func.func @transform_2(%arg0: i32, %arg1: i32) -> (i32, i32) {
    %c0_i32 = arith.constant 0 : i32
    %c0_i32_0 = arith.constant 0 : i32
    %c0_i32_1 = arith.constant 0 : i32
    return %c0_i32, %c0_i32_0 : i32, i32
  }
  func.func @transform_3(%arg0: i32, %arg1: i32) -> (i32, i32, i32, i32) {
    %c0_i32 = arith.constant 0 : i32
    %c0_i32_0 = arith.constant 0 : i32
    %c0_i32_1 = arith.constant 0 : i32
    return %arg0, %c0_i32, %arg1, %c0_i32_0 : i32, i32, i32, i32
  }
  func.func @transform_4(%arg0: i32, %arg1: i32) -> (i32, i32, i32, i32) {
    %c0_i32 = arith.constant 0 : i32
    %c0_i32_0 = arith.constant 0 : i32
    %c0_i32_1 = arith.constant 0 : i32
    return %arg0, %c0_i32, %arg1, %c0_i32_0 : i32, i32, i32, i32
  }
  func.func @transform_5(%arg0: i32, %arg1: i32) -> (i32, i32, i32, i32) {
    %c0_i32 = arith.constant 0 : i32
    %c0_i32_0 = arith.constant 0 : i32
    %c0_i32_1 = arith.constant 0 : i32
    return %arg0, %c0_i32, %arg1, %c0_i32_0 : i32, i32, i32, i32
  }
}

</mosaic_0001>

<bundles_post_ra>
// kernel: tpu_custom_call.1
= control target key start
LH: loop header
LB: loop body
LE: loop exit
PB: predicated region body
PF: predicated region fallthrough
CT: control target
= control target key end

     0   :  { %11 = vsyncpa [#allocation3], 0  ;;  %s1380_s0 = inlined_call_operand.hbm [shape: bf16[2,8,32], index: 0, kind: input, shape index: {}]   ;;  %s1381_s1 = inlined_call_operand.hbm [shape: bf16[32,96], index: 1, kind: input, shape index: {}]   ;;  %s1382_s2 = inlined_call_operand.vmem [shape: f32[1,96], index: 2, kind: input, shape index: {}]   ;;  %s1383_s3 = inlined_call_operand.hbm [shape: bf16[2,4,8,8], index: 3, kind: output, shape index: {0}]   ;;  %s1384_s4 = inlined_call_operand.hbm [shape: bf16[2,4,8,8], index: 4, kind: output, shape index: {1}]   ;;  %s1385_s5 = inlined_call_operand.hbm [shape: bf16[2,4,8,8], index: 5, kind: output, shape index: {2}]  }
   0x1   :  { %13 = vsyncpa [#allocation3 + $0x1], 0 }
   0x2   :  { %14 = vsyncpa [#allocation6], 0 }
   0x3   :  { %15 = vsyncpa [#allocation4], 0 }
   0x4   :  { %17 = vsyncpa [#allocation4 + $0x1], 0 }
   0x5   :  { %18 = vsyncpa [#allocation9], 0 }
   0x6   :  { %20 = vsyncpa [#allocation9 + $0x1], 0  ;;  %s1051_s18 = smov 0   ;;  %s1053_s19 = smov 0  }
   0x7   :  { %s1055_s20 = smov 0   ;;  %s1057_s21 = smov 0  }
   0x8   :  { %s1059_s22 = smov 0   ;;  %s1061_s23 = smov 0  }
   0x9 LB: > { %s1082_s24 = sadd.s32 4294967295, %s998_s23   ;;  %s1389_s25 = sadd.s32 4294967294, %s998_s23   ;;  %s998_s23 = sphi %s1061_s23, %s26_s23   ;;  %s994_s22 = sphi %s1059_s22, %s1411_s22   ;;  %s990_s21 = sphi %s1057_s21, %s1410_s21   ;;  %s986_s20 = sphi %s1055_s20, %s1409_s20   ;;  %s982_s19 = sphi %s1053_s19, %s1408_s19   ;;  %s978_s18 = sphi %s1051_s18, %s1407_s18  }
   0xa   : > { %p60_p0 = scmp.ne.s32.totalorder %s982_s19, %s978_s18  ;;  %p1386_p1 = scmp.eq.s32.totalorder %s1082_s24, 0 }
   0xb   : > { %p134_p3 = scmp.eq.s32.totalorder %s1389_s25, 1  ;;  %p642_p5 = scmp.ge.s32.totalorder %s998_s23, 1 }
   0xc   : > { %p1093_p4 = por %p1386_p1, %p60_p0  ;;  %p197_p7 = scmp.lt.s32.totalorder %s998_s23, 3 }
   0xd   : > { %p1098_p6 = por %p134_p3, %p60_p0  ;;  %s1000_s29 = smov [#allocation5]  }
   0xe   : > { %s1390_s26 = scalar_select %p1093_p4, 1, 0 }
   0xf   : > { %s1391_s27 = scalar_select %p1098_p6, 1, 0 }
  0x10   : > { %p1103_p8 = pnand %p642_p5, %p197_p7  ;;  %s209_s30 = sshll.u32 %s1000_s29, 4  ;;  %s210_s30 = int_to_ptr.vmem [resolvable:$true] %s209_s30 }
  0x11   : > { %s38_s7 = sadd.s32 1, %s994_s22  ;;  %s794_s10 = scalar_lea.hbm %s1381_s1, 256 }
  0x12   : > { %s1392_s28 = scalar_select %p1103_p8, 1, 0 }
  0x13   : > { %p705_p9 = pneg %p1103_p8  ;;  %p795_p12 = scmp.ne.s32.totalorder %s1381_s1, %s794_s10 }
  0x14   : > { %p801_p5 = scmp.lt.u32.totalorder %s794_s10, %s1381_s1 }
  0x15   : > { %p1112_p11 = pnand %p705_p9, %p1386_p1 }
  0x17   : > { %p796_p13 = pneg %p1112_p11 }
  0x19   : > { %p797_p0 = pnand %p796_p13, %p795_p12 }
  0x1b   : > { %p798_p3 = pneg %p797_p0 }
  0x1d   : > { %p803_p7 = pnand %p801_p5, %p798_p3 }
  0x1f   : > { %806 = shalt.err (!%p803_p7)
}
  0x20   : > { %s807_s15 = scalar_lea.vmem %s210_s30, 256  ;;  %p815_p2 = scmp.lt.s32.totalorder %s210_s30, %s210_s30 }
  0x21   : > { %p808_p9 = scmp.ne.s32.totalorder %s210_s30, %s807_s15  ;;  %p816_p6 = scmp.lt.s32.totalorder %s807_s15, %s807_s15 }
  0x23   : > { %p810_p10 = pnand %p808_p9, %p796_p13  ;;  %p817_p4 = por %p816_p6, %p815_p2 }
  0x25   : > { %p811_p1 = pneg %p810_p10 }
  0x27   : > { %p818_p8 = pnand %p817_p4, %p811_p1 }
  0x29   : > { %821 = shalt.err (!%p818_p8)
}
  0x2a   : > { %s1001_s16 = smov 64   ;;  %s1002_s17 = smov 4  }
  0x2b   : > { %708 = dma.hbm_to_vmem [thread:$0]  (!%p1112_p11), %s1381_s1, 256, %s210_s30, [#allocation6], %s1001_s16, %s1001_s16, %s1002_s17  }
  0x2c   : > { %p40_p1 = scmp.ge.s32.totalorder %s38_s7, 2  ;;  %s47_s9 = sadd.s32 1, %s986_s20 }
  0x2d   : > { %p54_p2 = scmp.ne.s32.totalorder %s986_s20, %s982_s19  ;;  %p55_p4 = scmp.eq.s32.totalorder %s998_s23, 0 }
  0x2e   : > { %s1413_s7 = smov (%p40_p1, %s38_s7), 0  ;;  %p1395_p8 = scmp.eq.s32.totalorder %s1082_s24, 1 }
  0x2f   : > { %p1139_p6 = por %p55_p4, %p54_p2  ;;  %s42_s6 = ssub.s32 %s994_s22, %s1413_s7 }
  0x30   : > { %p1145_p10 = por %p1395_p8, %p54_p2  ;;  %p724_p12 = scmp.lt.s32.totalorder %s998_s23, 2 }
  0x31   : > { %p45_p11 = scmp.eq.s32.totalorder %s42_s6, 0  ;;  %s226_s30 = sand.u32 1, %s986_s20  }
  0x32   : > { %s645_s12 = sshll.u32 %s226_s30, 2  ;;  %s646_s14 = sshll.u32 %s994_s22, 6 }
  0x33   : > { %s1154_s13 = scalar_select %p45_p11, %s986_s20, %s47_s9  }
  0x34   : > { %s1160_s17 = scalar_lea.hbm %s1380_s0, %s646_s14  ;;  %s230_s29 = scalar_lea.vmem [#allocation2], %s645_s12 }
  0x35   : > { %s238_s8 = sshll.u32 %s230_s29, 4  ;;  %p1166_p13 = pnand %p724_p12, %p1139_p6  ;;  %s1162_s8 = int_to_ptr.vmem [resolvable:$true] %s238_s8 }
  0x36   : > { %s227_s9 = scalar_lea.sflag [#allocation3], %s226_s30  ;;  %s822_s25 = scalar_lea.hbm %s1160_s17, 64 }
  0x37   : > { %p823_p0 = scmp.ne.s32.totalorder %s1160_s17, %s822_s25  ;;  %p824_p3 = pneg %p1166_p13 }
  0x38   : > { %s827_s15 = scalar_lea.hbm %s1380_s0, 128  ;;  %p828_p9 = scmp.lt.u32.totalorder %s1160_s17, %s1380_s0 }
  0x39   : > { %p825_p5 = pnand %p824_p3, %p823_p0  ;;  %p829_p1 = scmp.lt.u32.totalorder %s827_s15, %s822_s25 }
  0x3a   : > { %p831_p4 = scmp.lt.u32.totalorder %s822_s25, %s1160_s17 }
  0x3b   : > { %p826_p7 = pneg %p825_p5  ;;  %p830_p2 = por %p829_p1, %p828_p9 }
  0x3d   : > { %p832_p6 = por %p831_p4, %p830_p2 }
  0x3f   : > { %p833_p8 = pnand %p832_p6, %p826_p7 }
  0x41   : > { %836 = shalt.err (!%p833_p8)
}
  0x42   : > { %s837_s30 = scalar_lea.vmem %s1162_s8, 64  ;;  %s1003_s29 = smov [#allocation2]  }
  0x43   : > { %p838_p12 = scmp.ne.s32.totalorder %s1162_s8, %s837_s30  ;;  %s842_s12 = sshll.u32 %s1003_s29, 4  ;;  %s843_s12 = int_to_ptr.vmem [resolvable:$false] %s842_s12 }
  0x44   : > { %s844_s14 = scalar_lea.vmem %s843_s12, 128  ;;  %p845_p5 = scmp.lt.s32.totalorder %s1162_s8, %s843_s12 }
  0x45   : > { %p840_p11 = pnand %p838_p12, %p824_p3  ;;  %p846_p9 = scmp.lt.s32.totalorder %s844_s14, %s837_s30 }
  0x47   : > { %p841_p0 = pneg %p840_p11  ;;  %p847_p1 = por %p846_p9, %p845_p5 }
  0x49   : > { %p848_p2 = pnand %p847_p1, %p841_p0 }
  0x4b   : > { %851 = shalt.err (!%p848_p2)
}
  0x4c   : > { %712 = dma.hbm_to_vmem [thread:$0]  (!%p1166_p13), %s1160_s17, 64, %s1162_s8, %s227_s9  }
  0x4d   : > { %p1398_p7 = scmp.ne.s32.totalorder %s1392_s28, 0 }
  0x4e   : > { %s1198_s25 = sand.u32 (!%p1398_p7), 1, %s982_s19   ;;  %p1399_p3 = scmp.ne.s32.totalorder (!%p1398_p7), %s1390_s26, 0 }
  0x4f   : > { %247 = sbr.rel (%p1398_p7) target bundleno = 496 (0x1f0), region = 32  ;;  %s648_s15 = sshll.u32 (!%p1398_p7), %s1198_s25, 2 }
  0x50   : > { %s250_s10 = scalar_lea.sflag (!%p1398_p7), [#allocation3], %s1198_s25  ;;  %s253_s16 = scalar_lea.vmem (!%p1398_p7), [#allocation2], %s648_s15 }
  0x56   : > { %961 = dma.done.wait (%p1399_p3), %s250_s10, 64  }
  0x57   : > { %963 = vsyncadd (%p1399_p3), %s250_s10, 4294967232  ;;  %p1400_p4 = scmp.eq.s32.totalorder %s1082_s24, 0 }
  0x59   : > { %965 = dma.done.wait (%p1400_p4), [#allocation6], 256   ;;  %p1401_p13 = pmov %p1400_p4 }
  0x5a   : > { %v1004_v0 = vmov 0.0   ;;  %vm1005_vm0 = vmmov 0   ;;  %v792_v1 = vld [vmem:[#allocation5] sm:$0xff]   ;;  %v793_v2 = vld [vmem:[#allocation5 + $0x8] sm:$0xff]   ;;  %v295_v3 = vld [vmem:[%s253_s16] sm:$0xf] }
  0x5b   : > { %967 = vsyncadd (%p1401_p13), [#allocation6], 4294967040  ;;  %685 = vmatprep.subr.bf16.mxu0 %v1004_v0  ;;  %689 = vmatprep.mubr.msk.bf16.mxu0 %vm1005_vm0, %v1004_v0  ;;  %vm319_vm1 = vcmask 261120   ;;  %v653_v4 = vld [vmem:[%s1382_s2] ss:$0 sm:$0xff]  ;;  %s1214_s17 = sshll.u32 %s1198_s25, 4 }
  0x5c   : > { %686 = vmatpush3.bf16.msra.mxu0 %v792_v1  ;;  %vm364_vm2 = vcmask 60416   ;;  %s1006_s8 = smov 80   ;;  %s1007_s6 = smov 96  }
  0x5d   : > { %687 = vmatprep.subr.bf16.mxu0 %v1004_v0  ;;  %s1217_s9 = scalar_lea.vmem [#allocation7], %s1214_s17  ;;  %s1008_s30 = smov 72  }
  0x5e   : > { %s1009_s29 = smov 88   ;;  %s1010_s12 = smov 120  }
  0x5f   : > { %s1011_s14 = smov 64   ;;  %s1012_s15 = smov 112  }
  0x60   : > { %688 = vmatpush3.bf16.msra.mxu0 %v793_v2  ;;  %s1013_s10 = smov 56   ;;  %s1014_s16 = smov 104  }
  0x61   : > { %s1015_s26 = smov 48   ;;  %s1016_s28 = smov 40  }
  0x63   : > { %690 = vmatmul.mubr.msk.bf16.vlgmr.msra.gmra.mrb[0].mxu0 %vm319_vm1, %v295_v3 }
 0x136   : > { %v357_v5 = vpop.f32.mrb[0].mxu0 }
 0x137   : > { %v358_v6 = vadd.f32 %v653_v4, %v357_v5  ;;  %v691_v7 = vpop.f32.mrb[1].mxu0 }
 0x138   : > { %v360_v8 = vpop.f32.mrb[2].mxu0 }
 0x139   : > { %v363_v9 = vpack.c.bf16 %v358_v6, %v358_v6  ;;  %v692_v10 = vpop.f32.mrb[3].mxu0 }
 0x13b   : > { %397 = vrot.lane.b32.xlu1 %v363_v9, %s1006_s8  ;;  %369 = vrot.lane.b32.xlu0 %v363_v9, %s1007_s6  ;;  %365 = vst.msk [vmem:[%s1217_s9] sm:$0xf] %vm364_vm2, %v363_v9  ;;  %s286_s8 = scalar_lea.vmem [#allocation8], %s1214_s17 }
 0x13c   : > { %s464_s6 = sshll.u32 %s286_s8, 4  ;;  %s1229_s6 = int_to_ptr.vmem [resolvable:$true] %s464_s6 }
 0x13f   : > { %412 = vrot.lane.b32.xlu1 %v363_v9, %s1008_s30  ;;  %382 = vrot.lane.b32.xlu0 %v363_v9, %s1009_s29  ;;  %s427_s30 = sand.u32 1, %s1082_s24   ;;  %s1225_s29 = sshll.u32 %s990_s21, 8 }
 0x140   : > { %s1239_s21 = scalar_lea.sflag [#allocation9], %s427_s30  ;;  %s852_s24 = scalar_lea.vmem %s1229_s6, 256 }
 0x141   : > { %p853_p6 = scmp.ne.s32.totalorder %s1229_s6, %s852_s24 }
 0x143   : > { %377 = vrot.lane.b32.xlu1 %v363_v9, %s1010_s12  ;;  %373 = vrot.lane.b32.xlu0 %v363_v9, %s1011_s14  ;;  %p854_p8 = pnand %p853_p6, %p1145_p10 }
 0x145   : > { %p855_p12 = pneg %p854_p8 }
 0x147   : > { %392 = vrot.lane.b32.xlu1 %v363_v9, %s1012_s15  ;;  %387 = vrot.lane.b32.xlu0 %v363_v9, %s1013_s10  ;;  %s1235_s10 = scalar_lea.hbm %s1384_s4, %s1225_s29 }
 0x14b   : > { %407 = vrot.lane.b32.xlu1 %v363_v9, %s1014_s16  ;;  %402 = vrot.lane.b32.xlu0 %v363_v9, %s1015_s26  ;;  %s1017_s16 = smov [#allocation8]  }
 0x14c   : > { %s856_s26 = sshll.u32 %s1017_s16, 4  ;;  %s857_s26 = int_to_ptr.vmem [resolvable:$false] %s856_s26 }
 0x14d   : > { %p859_p11 = scmp.lt.s32.totalorder %s1229_s6, %s857_s26 }
 0x14f   : > { %417 = vrot.lane.b32.xlu0 %v363_v9, %s1016_s28  ;;  %s858_s28 = scalar_lea.vmem %s857_s26, 512 }
 0x150   : > { %p860_p0 = scmp.lt.s32.totalorder %s858_s28, %s852_s24 }
 0x152   : > { %p861_p5 = por %p860_p0, %p859_p11 }
 0x154   : > { %p862_p9 = pnand %p861_p5, %p855_p12 }
 0x1ad   : > { %v398_v11 = vpop.permute.xlu1 %397  ;;  %v370_v12 = vpop.permute.xlu0 %369 }
 0x1ae   : > { %662 = vst.msk [vmem:[%s286_s8 + $0x8] sm:$0xf] %vm364_vm2, %v398_v11  ;;  %372 = vst.msk [vmem:[%s286_s8] sm:$0xf] %vm364_vm2, %v370_v12 }
 0x1b1   : > { %v413_v13 = vpop.permute.xlu1 %412  ;;  %v383_v14 = vpop.permute.xlu0 %382 }
 0x1b2   : > { %665 = vst.msk [vmem:[%s286_s8 + $0xc] sm:$0xf] %vm364_vm2, %v413_v13  ;;  %659 = vst.msk [vmem:[%s286_s8 + $0x4] sm:$0xf] %vm364_vm2, %v383_v14 }
 0x1b3   : > { %865 = shalt.err (!%p862_p9)
}
 0x1b4   : > { %s866_s8 = scalar_lea.hbm %s1235_s10, 256  ;;  %s870_s15 = scalar_lea.hbm %s1384_s4, 512 }
 0x1b5   : > { %p867_p1 = scmp.ne.s32.totalorder %s1235_s10, %s866_s8  ;;  %p871_p3 = scmp.lt.u32.totalorder %s1235_s10, %s1384_s4 }
 0x1b6   : > { %p872_p4 = scmp.lt.u32.totalorder %s870_s15, %s866_s8  ;;  %p874_p6 = scmp.lt.u32.totalorder %s866_s8, %s1235_s10 }
 0x1b7   : > { %p868_p2 = pnand %p867_p1, %p1145_p10 }
 0x1b8   : > { %p873_p13 = por %p872_p4, %p871_p3 }
 0x1b9   : > { %p869_p7 = pneg %p868_p2 }
 0x1ba   : > { %p875_p8 = por %p874_p6, %p873_p13 }
 0x1bc   : > { %p876_p12 = pnand %p875_p8, %p869_p7 }
 0x1be   : > { %879 = shalt.err (!%p876_p12)
}
 0x1bf   : > { %s1018_s24 = smov 4   ;;  %v378_v15 = vpop.permute.xlu1 %377  ;;  %v374_v16 = vpop.permute.xlu0 %373  ;;  %s1269_s28 = scalar_lea.vmem [#allocation10], %s1214_s17 }
 0x1c0   : > { %700 = dma.vmem_to_hbm [thread:$0]  (%p1145_p10), %s1229_s6, 256, %s1235_s10, %s1239_s21, %s1011_s14, %s1011_s14, %s1018_s24  }
 0x1c1   : > { %658 = vst.msk [vmem:[%s1217_s9 + $0x4] sm:$0xf] %vm364_vm2, %v378_v15  ;;  %376 = vst.msk [vmem:[%s1269_s28] sm:$0xf] %vm364_vm2, %v374_v16  ;;  %s447_s8 = sshll.u32 %s1217_s9, 4  ;;  %s1284_s17 = scalar_lea.hbm %s1383_s3, %s1225_s29  ;;  %s1278_s8 = int_to_ptr.vmem [resolvable:$true] %s447_s8 }
 0x1c2   : > { %s880_s15 = scalar_lea.vmem %s1278_s8, 256  ;;  %s1019_s16 = smov [#allocation7]  }
 0x1c3   : > { %v393_v17 = vpop.permute.xlu1 %392  ;;  %v388_v18 = vpop.permute.xlu0 %387  ;;  %p881_p11 = scmp.ne.s32.totalorder %s1278_s8, %s880_s15  ;;  %s884_s26 = sshll.u32 %s1019_s16, 4  ;;  %s885_s26 = int_to_ptr.vmem [resolvable:$false] %s884_s26 }
 0x1c4   : > { %661 = vst.msk [vmem:[%s1217_s9 + $0x8] sm:$0xf] %vm364_vm2, %v393_v17  ;;  %660 = vst.msk [vmem:[%s1269_s28 + $0x4] sm:$0xf] %vm364_vm2, %v388_v18  ;;  %s886_s6 = scalar_lea.vmem %s885_s26, 512  ;;  %p887_p9 = scmp.lt.s32.totalorder %s1278_s8, %s885_s26 }
 0x1c5   : > { %p882_p0 = pnand %p881_p11, %p1145_p10  ;;  %p888_p1 = scmp.lt.s32.totalorder %s886_s6, %s880_s15 }
 0x1c7   : > { %v408_v19 = vpop.permute.xlu1 %407  ;;  %v403_v20 = vpop.permute.xlu0 %402  ;;  %p883_p5 = pneg %p882_p0  ;;  %p889_p2 = por %p888_p1, %p887_p9 }
 0x1c8   : > { %664 = vst.msk [vmem:[%s1217_s9 + $0xc] sm:$0xf] %vm364_vm2, %v408_v19  ;;  %663 = vst.msk [vmem:[%s1269_s28 + $0x8] sm:$0xf] %vm364_vm2, %v403_v20 }
 0x1c9   : > { %p890_p7 = pnand %p889_p2, %p883_p5 }
 0x1cb   : > { %893 = shalt.err (!%p890_p7)
}
 0x1cc   : > { %s894_s9 = scalar_lea.hbm %s1284_s17, 256  ;;  %s898_s16 = scalar_lea.hbm %s1383_s3, 512 }
 0x1cd   : > { %p895_p3 = scmp.ne.s32.totalorder %s1284_s17, %s894_s9  ;;  %p899_p6 = scmp.lt.u32.totalorder %s1284_s17, %s1383_s3 }
 0x1ce   : > { %p900_p8 = scmp.lt.u32.totalorder %s898_s16, %s894_s9  ;;  %p902_p11 = scmp.lt.u32.totalorder %s894_s9, %s1284_s17 }
 0x1cf   : > { %p896_p4 = pnand %p895_p3, %p1145_p10 }
 0x1d0   : > { %p901_p12 = por %p900_p8, %p899_p6 }
 0x1d1   : > { %p897_p13 = pneg %p896_p4 }
 0x1d2   : > { %p903_p0 = por %p902_p11, %p901_p12 }
 0x1d4   : > { %p904_p5 = pnand %p903_p0, %p897_p13 }
 0x1d6   : > { %907 = shalt.err (!%p904_p5)
}
 0x1d7   : > { %s1402_s15 = scalar_lea.sflag [#allocation4], %s1198_s25  ;;  %s1403_s30 = sshll.u32 %s1269_s28, 4  ;;  %v418_v21 = vpop.permute.xlu0 %417  ;;  %s1320_s30 = int_to_ptr.vmem [resolvable:$true] %s1403_s30 }
 0x1d8   : > { %699 = dma.vmem_to_hbm [thread:$0]  (%p1145_p10), %s1278_s8, 256, %s1284_s17, %s1402_s15, %s1011_s14, %s1011_s14, %s1018_s24  }
 0x1d9   : > { %s1326_s9 = scalar_lea.hbm %s1385_s5, %s1225_s29  ;;  %666 = vst.msk [vmem:[%s1269_s28 + $0xc] sm:$0xf] %vm364_vm2, %v418_v21  ;;  %s908_s25 = scalar_lea.vmem %s1320_s30, 256 }
 0x1da   : > { %p909_p9 = scmp.ne.s32.totalorder %s1320_s30, %s908_s25  ;;  %s1020_s8 = smov [#allocation10]  }
 0x1db   : > { %s912_s17 = sshll.u32 %s1020_s8, 4  ;;  %s913_s17 = int_to_ptr.vmem [resolvable:$false] %s912_s17 }
 0x1dc   : > { %p910_p1 = pnand %p909_p9, %p1145_p10  ;;  %s914_s10 = scalar_lea.vmem %s913_s17, 512 }
 0x1dd   : > { %p915_p7 = scmp.lt.s32.totalorder %s1320_s30, %s913_s17  ;;  %p916_p3 = scmp.lt.s32.totalorder %s914_s10, %s908_s25 }
 0x1de   : > { %p911_p2 = pneg %p910_p1 }
 0x1df   : > { %p917_p4 = por %p916_p3, %p915_p7 }
 0x1e1   : > { %p918_p13 = pnand %p917_p4, %p911_p2 }
 0x1e3   : > { %921 = shalt.err (!%p918_p13)
}
 0x1e4   : > { %s922_s29 = scalar_lea.hbm %s1326_s9, 256  ;;  %s926_s26 = scalar_lea.hbm %s1385_s5, 512 }
 0x1e5   : > { %p923_p6 = scmp.ne.s32.totalorder %s1326_s9, %s922_s29  ;;  %p927_p11 = scmp.lt.u32.totalorder %s1326_s9, %s1385_s5 }
 0x1e6   : > { %p928_p0 = scmp.lt.u32.totalorder %s926_s26, %s922_s29  ;;  %p930_p9 = scmp.lt.u32.totalorder %s922_s29, %s1326_s9 }
 0x1e7   : > { %p924_p8 = pnand %p923_p6, %p1145_p10 }
 0x1e8   : > { %p929_p5 = por %p928_p0, %p927_p11 }
 0x1e9   : > { %p925_p12 = pneg %p924_p8 }
 0x1ea   : > { %p931_p1 = por %p930_p9, %p929_p5 }
 0x1ec   : > { %p932_p2 = pnand %p931_p1, %p925_p12 }
 0x1ee   : > { %935 = shalt.err (!%p932_p2)
}
 0x1ef   : > { %701 = dma.vmem_to_hbm [thread:$0]  (%p1145_p10), %s1320_s30, 256, %s1326_s9, %s1239_s21, %s1011_s14, %s1011_s14, %s1018_s24  }
 0x1f0 PF: > { %s496_s6 = sand.u32 1, %s978_s18   ;;  %p1404_p7 = scmp.ne.s32.totalorder %s1391_s27, 0 }
 0x1f1   : > { %p1405_p3 = scmp.ge.s32.totalorder %s998_s23, 2  ;;  %s497_s25 = scalar_lea.sflag [#allocation4], %s496_s6 }
 0x1f3   : > { %p714_p4 = pnand %p1405_p3, %p1404_p7 }
 0x1f5   : > { %969 = dma.done.wait (!%p714_p4), %s497_s25, 256  }
 0x1f6   : > { %971 = vsyncadd (!%p714_p4), %s497_s25, 4294967040  ;;  %s1406_s11 = sadd.s32 4294967294, %s998_s23  }
 0x1f7   : > { %s505_s8 = sand.u32 1, %s1406_s11  }
 0x1f8   : > { %s506_s17 = scalar_lea.sflag [#allocation9], %s505_s8 }
 0x1f9   : > { %973 = dma.done.wait (!%p714_p4), %s506_s17, 512  }
 0x1fa   : > { %975 = vsyncadd (!%p714_p4), %s506_s17, 4294966784  ;;  %s26_s23 = sadd.s32 1, %s998_s23   ;;  %s1407_s18 = smov %s982_s19 }
 0x1fb   : > { %p23_p10 = scmp.ge.s32.totalorder %s26_s23, 4   ;;  %s1408_s19 = smov %s986_s20 }
 0x1fc   : > { %s1409_s20 = smov %s1154_s13  ;;  %s1410_s21 = smov %s994_s22 }
 0x1fd   : > { %s1411_s22 = smov %s1413_s7  ;;  %25 = sbr.rel (!%p23_p10) target bundleno = 9 (0x9), region = 122 }
 0x204   :  { %520 = vsyncpa [#allocation3], 1 }
 0x205   :  { %522 = vsyncpa [#allocation3 + $0x1], 1 }
 0x206   :  { %523 = vsyncpa [#allocation6], 1 }
 0x207   :  { %524 = vsyncpa [#allocation4], 1 }
 0x208   :  { %526 = vsyncpa [#allocation4 + $0x1], 1 }
 0x209   :  { %527 = vsyncpa [#allocation9], 1 }
 0x20a   :  { %529 = vsyncpa [#allocation9 + $0x1], 1 }

</bundles_post_ra>
